<compile_context>
chip_gen: v5e
topology: v5e:2x2
jax: 0.10.0
libtpu: 0.0.40
codegen_flags: <defaults>
</compile_context>

<pallas_src>
import jax
import jax.numpy as jnp
from jax.experimental import pallas as pl
from jax.experimental.pallas import tpu as pltpu

IMAGE_SIZE = 784
LAYER_DIMS = [(IMAGE_SIZE, 128), (128, 64), (64, 10), (10, 10), (10, 10), (10, 10)]
N_CLASSES = 10
N_PAD = 128  # lane-dense width for the final logits slab


def _round_up(n, m):
    return ((n + m - 1) // m) * m


def mlp_kernel(x_ref,
               w0_ref, b0_ref, w1_ref, b1_ref, w2_ref, b2_ref,
               w3_ref, b3_ref, w4_ref, b4_ref, w5_ref, b5_ref,
               o_ref):
    def dense(h_bf16, w_ref, b_ref):
        # bf16 x bf16 on the MXU, f32 accumulation, f32 bias add.
        return jnp.dot(h_bf16, w_ref[...],
                       preferred_element_type=jnp.float32) + b_ref[...]

    def sigmoid(z):
        # explicit form (VPU + EUP), f32 throughout
        return 1.0 / (1.0 + jnp.exp(-z))

    h = sigmoid(dense(x_ref[...], w0_ref, b0_ref))                     # (TB, 128) f32
    h = sigmoid(dense(h.astype(jnp.bfloat16), w1_ref, b1_ref))         # (TB, 64)
    h = sigmoid(dense(h.astype(jnp.bfloat16), w2_ref, b2_ref))         # (TB, 10)
    h = sigmoid(dense(h.astype(jnp.bfloat16), w3_ref, b3_ref))         # (TB, 10)
    h = sigmoid(dense(h.astype(jnp.bfloat16), w4_ref, b4_ref))         # (TB, 10)
    # Final layer: lane-padded to N_PAD; padded lanes carry a -1e30 bias so
    # they behave like -inf in the log_softmax below.
    logits = dense(h.astype(jnp.bfloat16), w5_ref, b5_ref)             # (TB, 128) f32

    # numerically stable log_softmax over the last axis
    m = jnp.max(logits, axis=-1, keepdims=True)
    shifted = logits - m
    lse = jnp.log(jnp.sum(jnp.exp(shifted), axis=-1, keepdims=True))
    o_ref[...] = shifted - lse


def mlp_forward(x, params, *, tb=1024):
    """x: any shape whose trailing size flattens to (B, 784), like torch .view(-1, 784)."""
    x2d = x.reshape(-1, IMAGE_SIZE)
    B = x2d.shape[0]

    # Batch tile: multiple of 8 (sublane), capped so tiny batches use one step.
    TB = min(tb, _round_up(max(B, 1), 8))
    Bp = _round_up(B, TB)
    if Bp != B:
        x2d = jnp.pad(x2d, ((0, Bp - B), (0, 0)))
    x_bf16 = x2d.astype(jnp.bfloat16)

    # Prep weights: (out,in) -> (in,out), bf16; biases kept f32 as (1, N).
    ws, bs = [], []
    for (w, b) in params:
        ws.append(w.T.astype(jnp.bfloat16))
        bs.append(b.reshape(1, -1).astype(jnp.float32))
    # Lane-pad the last layer's output dim 10 -> 128 (zeros in W, -1e30 in bias).
    w5 = jnp.zeros((ws[-1].shape[0], N_PAD), jnp.bfloat16).at[:, :N_CLASSES].set(ws[-1])
    b5 = jnp.full((1, N_PAD), -1e30, jnp.float32).at[:, :N_CLASSES].set(bs[-1])
    ws[-1], bs[-1] = w5, b5

    grid = (Bp // TB,)

    def resident_spec(arr):
        # Full-array block, constant index map -> stays in VMEM, no re-DMA per step.
        return pl.BlockSpec(arr.shape, lambda i: (0, 0))

    in_specs = [pl.BlockSpec((TB, IMAGE_SIZE), lambda i: (i, 0))]
    operands = [x_bf16]
    for w, b in zip(ws, bs):
        in_specs += [resident_spec(w), resident_spec(b)]
        operands += [w, b]

    flops = 2 * Bp * sum(fi * fo for fi, fo in LAYER_DIMS)
    transcendentals = Bp * (128 + 64 + 10 + 10 + 10 + N_PAD)  # sigmoids + softmax exps
    bytes_accessed = (Bp * IMAGE_SIZE * 2
                      + sum(w.size * 2 + b.size * 4 for w, b in zip(ws, bs))
                      + Bp * N_PAD * 4)

    out = pl.pallas_call(
        mlp_kernel,
        out_shape=jax.ShapeDtypeStruct((Bp, N_PAD), jnp.float32),
        grid=grid,
        in_specs=in_specs,
        out_specs=pl.BlockSpec((TB, N_PAD), lambda i: (i, 0)),
        compiler_params=pltpu.CompilerParams(
            dimension_semantics=("parallel",),      # megacore / v7x dual-TC sharding
            vmem_limit_bytes=32 * 1024 * 1024,      # safe on v5e/v6e/v7x for TB<=2048 bf16
        ),
        cost_estimate=pl.CostEstimate(
            flops=flops,
            transcendentals=transcendentals,
            bytes_accessed=bytes_accessed,
        ),
    )(*operands)

    return out[:B, :N_CLASSES]


def mlp_reference(x, params):
    """Pure-JAX reference replicating the kernel's bf16/f32 arithmetic."""
    h = x.reshape(-1, IMAGE_SIZE).astype(jnp.bfloat16)
    *hidden, (w_last, b_last) = params
    for (w, b) in hidden:
        z = jnp.dot(h, w.T.astype(jnp.bfloat16),
                    preferred_element_type=jnp.float32) + b
        h = (1.0 / (1.0 + jnp.exp(-z))).astype(jnp.bfloat16)
    logits = jnp.dot(h, w_last.T.astype(jnp.bfloat16),
                     preferred_element_type=jnp.float32) + b_last
    return jax.nn.log_softmax(logits, axis=-1)


def init_params(key):
    """Deterministic init mimicking torch.nn.Linear default (uniform +-1/sqrt(fan_in))."""
    params = []
    for (fan_in, fan_out) in LAYER_DIMS:
        key, kw, kb = jax.random.split(key, 3)
        bound = 1.0 / jnp.sqrt(fan_in)
        w = jax.random.uniform(kw, (fan_out, fan_in), jnp.float32, -bound, bound)
        b = jax.random.uniform(kb, (fan_out,), jnp.float32, -bound, bound)
        params.append((w, b))
    return params


if __name__ == "__main__":
    key = jax.random.PRNGKey(0)
    k_x, k_p = jax.random.split(key)

    # small batch of "images": (2, 1, 28, 28) -> view(-1, 784) -> (2, 784)
    x = jax.random.normal(k_x, (2, 1, 28, 28), dtype=jnp.float32)
    params = init_params(k_p)

    out = mlp_forward(x, params)
    jax.block_until_ready(out)

    assert out.shape == (2, N_CLASSES)

    # log_softmax rows should exp-sum to ~1
    row_sums = jnp.sum(jnp.exp(out), axis=-1)
    assert bool(jnp.all(jnp.abs(row_sums - 1.0) < 1e-3))

    # match the pure-JAX reference (same bf16/f32 arithmetic)
    ref = mlp_reference(x, params)
    assert bool(jnp.max(jnp.abs(out - ref)) < 2e-2)

    print("KERNEL_OK")
</pallas_src>

<mosaic_0001>
module attributes {stable_mosaic.version = 11 : i64} {
  func.func @mlp_kernel(%arg0: i32, %arg1: memref<8x784xbf16, #tpu.memory_space<vmem>>, %arg2: memref<784x128xbf16, #tpu.memory_space<vmem>>, %arg3: memref<1x128xf32, #tpu.memory_space<vmem>>, %arg4: memref<128x64xbf16, #tpu.memory_space<vmem>>, %arg5: memref<1x64xf32, #tpu.memory_space<vmem>>, %arg6: memref<64x10xbf16, #tpu.memory_space<vmem>>, %arg7: memref<1x10xf32, #tpu.memory_space<vmem>>, %arg8: memref<10x10xbf16, #tpu.memory_space<vmem>>, %arg9: memref<1x10xf32, #tpu.memory_space<vmem>>, %arg10: memref<10x10xbf16, #tpu.memory_space<vmem>>, %arg11: memref<1x10xf32, #tpu.memory_space<vmem>>, %arg12: memref<10x128xbf16, #tpu.memory_space<vmem>>, %arg13: memref<1x128xf32, #tpu.memory_space<vmem>>, %arg14: memref<8x128xf32, #tpu.memory_space<vmem>>) attributes {dimension_semantics = [#tpu.dimension_semantics<parallel>], iteration_bounds = array<i64: 1>, scalar_prefetch = 0 : i64, scratch_operands = 0 : i64, tpu.core_type = #tpu.core_type<tc>, window_params = [{transform_indices = @transform_0, window_bounds = array<i64: 8, 784>}, {pipeline_mode = #tpu.pipeline_mode<synchronous>, transform_indices = @transform_1, window_bounds = array<i64: 784, 128>}, {pipeline_mode = #tpu.pipeline_mode<synchronous>, transform_indices = @transform_2, window_bounds = array<i64: 1, 128>}, {pipeline_mode = #tpu.pipeline_mode<synchronous>, transform_indices = @transform_3, window_bounds = array<i64: 128, 64>}, {pipeline_mode = #tpu.pipeline_mode<synchronous>, transform_indices = @transform_4, window_bounds = array<i64: 1, 64>}, {pipeline_mode = #tpu.pipeline_mode<synchronous>, transform_indices = @transform_5, window_bounds = array<i64: 64, 10>}, {pipeline_mode = #tpu.pipeline_mode<synchronous>, transform_indices = @transform_6, window_bounds = array<i64: 1, 10>}, {pipeline_mode = #tpu.pipeline_mode<synchronous>, transform_indices = @transform_7, window_bounds = array<i64: 10, 10>}, {pipeline_mode = #tpu.pipeline_mode<synchronous>, transform_indices = @transform_8, window_bounds = array<i64: 1, 10>}, {pipeline_mode = #tpu.pipeline_mode<synchronous>, transform_indices = @transform_9, window_bounds = array<i64: 10, 10>}, {pipeline_mode = #tpu.pipeline_mode<synchronous>, transform_indices = @transform_10, window_bounds = array<i64: 1, 10>}, {pipeline_mode = #tpu.pipeline_mode<synchronous>, transform_indices = @transform_11, window_bounds = array<i64: 10, 128>}, {pipeline_mode = #tpu.pipeline_mode<synchronous>, transform_indices = @transform_12, window_bounds = array<i64: 1, 128>}, {transform_indices = @transform_13, window_bounds = array<i64: 8, 128>}]} {
    %c0 = arith.constant 0 : index
    %c0_0 = arith.constant 0 : index
    %0 = vector.load %arg1[%c0, %c0_0] : memref<8x784xbf16, #tpu.memory_space<vmem>>, vector<8x784xbf16>
    %c0_1 = arith.constant 0 : index
    %c0_2 = arith.constant 0 : index
    %1 = vector.load %arg2[%c0_1, %c0_2] : memref<784x128xbf16, #tpu.memory_space<vmem>>, vector<784x128xbf16>
    %cst = arith.constant dense<0.000000e+00> : vector<8x128xf32>
    %2 = tpu.matmul %0, %1, %cst {dimension_numbers = #tpu.dot_dimension_numbers<[1], [0], [0], [1], [0, 0, 1, 1], [], []>} : vector<8x784xbf16>, vector<784x128xbf16>, vector<8x128xf32> -> vector<8x128xf32>
    %c0_3 = arith.constant 0 : index
    %c0_4 = arith.constant 0 : index
    %3 = vector.load %arg3[%c0_3, %c0_4] : memref<1x128xf32, #tpu.memory_space<vmem>>, vector<1x128xf32>
    %4 = vector.broadcast %3 : vector<1x128xf32> to vector<8x128xf32>
    %5 = arith.addf %2, %4 : vector<8x128xf32>
    %cst_5 = arith.constant 0.000000e+00 : f32
    %6 = vector.broadcast %cst_5 : f32 to vector<8x128xf32>
    %7 = arith.subf %6, %5 : vector<8x128xf32>
    %8 = math.exp %7 : vector<8x128xf32>
    %cst_6 = arith.constant 1.000000e+00 : f32
    %9 = vector.broadcast %cst_6 : f32 to vector<8x128xf32>
    %10 = arith.addf %9, %8 : vector<8x128xf32>
    %cst_7 = arith.constant 1.000000e+00 : f32
    %11 = vector.broadcast %cst_7 : f32 to vector<8x128xf32>
    %12 = arith.divf %11, %10 : vector<8x128xf32>
    %13 = arith.truncf %12 : vector<8x128xf32> to vector<8x128xbf16>
    %c0_8 = arith.constant 0 : index
    %c0_9 = arith.constant 0 : index
    %14 = vector.load %arg4[%c0_8, %c0_9] : memref<128x64xbf16, #tpu.memory_space<vmem>>, vector<128x64xbf16>
    %cst_10 = arith.constant dense<0.000000e+00> : vector<8x64xf32>
    %15 = tpu.matmul %13, %14, %cst_10 {dimension_numbers = #tpu.dot_dimension_numbers<[1], [0], [0], [1], [0, 0, 1, 1], [], []>} : vector<8x128xbf16>, vector<128x64xbf16>, vector<8x64xf32> -> vector<8x64xf32>
    %c0_11 = arith.constant 0 : index
    %c0_12 = arith.constant 0 : index
    %16 = vector.load %arg5[%c0_11, %c0_12] : memref<1x64xf32, #tpu.memory_space<vmem>>, vector<1x64xf32>
    %17 = vector.broadcast %16 : vector<1x64xf32> to vector<8x64xf32>
    %18 = arith.addf %15, %17 : vector<8x64xf32>
    %cst_13 = arith.constant 0.000000e+00 : f32
    %19 = vector.broadcast %cst_13 : f32 to vector<8x64xf32>
    %20 = arith.subf %19, %18 : vector<8x64xf32>
    %21 = math.exp %20 : vector<8x64xf32>
    %cst_14 = arith.constant 1.000000e+00 : f32
    %22 = vector.broadcast %cst_14 : f32 to vector<8x64xf32>
    %23 = arith.addf %22, %21 : vector<8x64xf32>
    %cst_15 = arith.constant 1.000000e+00 : f32
    %24 = vector.broadcast %cst_15 : f32 to vector<8x64xf32>
    %25 = arith.divf %24, %23 : vector<8x64xf32>
    %26 = arith.truncf %25 : vector<8x64xf32> to vector<8x64xbf16>
    %c0_16 = arith.constant 0 : index
    %c0_17 = arith.constant 0 : index
    %27 = vector.load %arg6[%c0_16, %c0_17] : memref<64x10xbf16, #tpu.memory_space<vmem>>, vector<64x10xbf16>
    %cst_18 = arith.constant dense<0.000000e+00> : vector<8x10xf32>
    %28 = tpu.matmul %26, %27, %cst_18 {dimension_numbers = #tpu.dot_dimension_numbers<[1], [0], [0], [1], [0, 0, 1, 1], [], []>} : vector<8x64xbf16>, vector<64x10xbf16>, vector<8x10xf32> -> vector<8x10xf32>
    %c0_19 = arith.constant 0 : index
    %c0_20 = arith.constant 0 : index
    %29 = vector.load %arg7[%c0_19, %c0_20] : memref<1x10xf32, #tpu.memory_space<vmem>>, vector<1x10xf32>
    %30 = vector.broadcast %29 : vector<1x10xf32> to vector<8x10xf32>
    %31 = arith.addf %28, %30 : vector<8x10xf32>
    %cst_21 = arith.constant 0.000000e+00 : f32
    %32 = vector.broadcast %cst_21 : f32 to vector<8x10xf32>
    %33 = arith.subf %32, %31 : vector<8x10xf32>
    %34 = math.exp %33 : vector<8x10xf32>
    %cst_22 = arith.constant 1.000000e+00 : f32
    %35 = vector.broadcast %cst_22 : f32 to vector<8x10xf32>
    %36 = arith.addf %35, %34 : vector<8x10xf32>
    %cst_23 = arith.constant 1.000000e+00 : f32
    %37 = vector.broadcast %cst_23 : f32 to vector<8x10xf32>
    %38 = arith.divf %37, %36 : vector<8x10xf32>
    %39 = arith.truncf %38 : vector<8x10xf32> to vector<8x10xbf16>
    %c0_24 = arith.constant 0 : index
    %c0_25 = arith.constant 0 : index
    %40 = vector.load %arg8[%c0_24, %c0_25] : memref<10x10xbf16, #tpu.memory_space<vmem>>, vector<10x10xbf16>
    %cst_26 = arith.constant dense<0.000000e+00> : vector<8x10xf32>
    %41 = tpu.matmul %39, %40, %cst_26 {dimension_numbers = #tpu.dot_dimension_numbers<[1], [0], [0], [1], [0, 0, 1, 1], [], []>} : vector<8x10xbf16>, vector<10x10xbf16>, vector<8x10xf32> -> vector<8x10xf32>
    %c0_27 = arith.constant 0 : index
    %c0_28 = arith.constant 0 : index
    %42 = vector.load %arg9[%c0_27, %c0_28] : memref<1x10xf32, #tpu.memory_space<vmem>>, vector<1x10xf32>
    %43 = vector.broadcast %42 : vector<1x10xf32> to vector<8x10xf32>
    %44 = arith.addf %41, %43 : vector<8x10xf32>
    %cst_29 = arith.constant 0.000000e+00 : f32
    %45 = vector.broadcast %cst_29 : f32 to vector<8x10xf32>
    %46 = arith.subf %45, %44 : vector<8x10xf32>
    %47 = math.exp %46 : vector<8x10xf32>
    %cst_30 = arith.constant 1.000000e+00 : f32
    %48 = vector.broadcast %cst_30 : f32 to vector<8x10xf32>
    %49 = arith.addf %48, %47 : vector<8x10xf32>
    %cst_31 = arith.constant 1.000000e+00 : f32
    %50 = vector.broadcast %cst_31 : f32 to vector<8x10xf32>
    %51 = arith.divf %50, %49 : vector<8x10xf32>
    %52 = arith.truncf %51 : vector<8x10xf32> to vector<8x10xbf16>
    %c0_32 = arith.constant 0 : index
    %c0_33 = arith.constant 0 : index
    %53 = vector.load %arg10[%c0_32, %c0_33] : memref<10x10xbf16, #tpu.memory_space<vmem>>, vector<10x10xbf16>
    %cst_34 = arith.constant dense<0.000000e+00> : vector<8x10xf32>
    %54 = tpu.matmul %52, %53, %cst_34 {dimension_numbers = #tpu.dot_dimension_numbers<[1], [0], [0], [1], [0, 0, 1, 1], [], []>} : vector<8x10xbf16>, vector<10x10xbf16>, vector<8x10xf32> -> vector<8x10xf32>
    %c0_35 = arith.constant 0 : index
    %c0_36 = arith.constant 0 : index
    %55 = vector.load %arg11[%c0_35, %c0_36] : memref<1x10xf32, #tpu.memory_space<vmem>>, vector<1x10xf32>
    %56 = vector.broadcast %55 : vector<1x10xf32> to vector<8x10xf32>
    %57 = arith.addf %54, %56 : vector<8x10xf32>
    %cst_37 = arith.constant 0.000000e+00 : f32
    %58 = vector.broadcast %cst_37 : f32 to vector<8x10xf32>
    %59 = arith.subf %58, %57 : vector<8x10xf32>
    %60 = math.exp %59 : vector<8x10xf32>
    %cst_38 = arith.constant 1.000000e+00 : f32
    %61 = vector.broadcast %cst_38 : f32 to vector<8x10xf32>
    %62 = arith.addf %61, %60 : vector<8x10xf32>
    %cst_39 = arith.constant 1.000000e+00 : f32
    %63 = vector.broadcast %cst_39 : f32 to vector<8x10xf32>
    %64 = arith.divf %63, %62 : vector<8x10xf32>
    %65 = arith.truncf %64 : vector<8x10xf32> to vector<8x10xbf16>
    %c0_40 = arith.constant 0 : index
    %c0_41 = arith.constant 0 : index
    %66 = vector.load %arg12[%c0_40, %c0_41] : memref<10x128xbf16, #tpu.memory_space<vmem>>, vector<10x128xbf16>
    %cst_42 = arith.constant dense<0.000000e+00> : vector<8x128xf32>
    %67 = tpu.matmul %65, %66, %cst_42 {dimension_numbers = #tpu.dot_dimension_numbers<[1], [0], [0], [1], [0, 0, 1, 1], [], []>} : vector<8x10xbf16>, vector<10x128xbf16>, vector<8x128xf32> -> vector<8x128xf32>
    %c0_43 = arith.constant 0 : index
    %c0_44 = arith.constant 0 : index
    %68 = vector.load %arg13[%c0_43, %c0_44] : memref<1x128xf32, #tpu.memory_space<vmem>>, vector<1x128xf32>
    %69 = vector.broadcast %68 : vector<1x128xf32> to vector<8x128xf32>
    %70 = arith.addf %67, %69 : vector<8x128xf32>
    %cst_45 = arith.constant dense<0xFF800000> : vector<8xf32>
    %71 = vector.multi_reduction <maximumf>, %70, %cst_45 [1] : vector<8x128xf32> to vector<8xf32>
    %72 = vector.shape_cast %71 : vector<8xf32> to vector<8x1xf32>
    %73 = vector.broadcast %72 : vector<8x1xf32> to vector<8x128xf32>
    %74 = arith.subf %70, %73 : vector<8x128xf32>
    %75 = math.exp %74 : vector<8x128xf32>
    %cst_46 = arith.constant dense<0.000000e+00> : vector<8xf32>
    %76 = vector.multi_reduction <add>, %75, %cst_46 [1] : vector<8x128xf32> to vector<8xf32>
    %77 = vector.shape_cast %76 : vector<8xf32> to vector<8x1xf32>
    %78 = math.log %77 : vector<8x1xf32>
    %79 = vector.broadcast %78 : vector<8x1xf32> to vector<8x128xf32>
    %80 = arith.subf %74, %79 : vector<8x128xf32>
    %c0_47 = arith.constant 0 : index
    %c0_48 = arith.constant 0 : index
    %81 = vector.load %arg14[%c0_47, %c0_48] : memref<8x128xf32, #tpu.memory_space<vmem>>, vector<8x128xf32>
    tpu.vector_store %arg14[%c0_47, %c0_48], %80 {strides = array<i32>} : memref<8x128xf32, #tpu.memory_space<vmem>>, vector<8x128xf32>,
    return
  }
  func.func @transform_0(%arg0: i32) -> (i32, i32) {
    %c0_i32 = arith.constant 0 : i32
    %c0_i32_0 = arith.constant 0 : i32
    return %arg0, %c0_i32 : i32, i32
  }
  func.func @transform_1(%arg0: i32) -> (i32, i32) {
    %c0_i32 = arith.constant 0 : i32
    %c0_i32_0 = arith.constant 0 : i32
    %c0_i32_1 = arith.constant 0 : i32
    return %c0_i32, %c0_i32_0 : i32, i32
  }
  func.func @transform_2(%arg0: i32) -> (i32, i32) {
    %c0_i32 = arith.constant 0 : i32
    %c0_i32_0 = arith.constant 0 : i32
    %c0_i32_1 = arith.constant 0 : i32
    return %c0_i32, %c0_i32_0 : i32, i32
  }
  func.func @transform_3(%arg0: i32) -> (i32, i32) {
    %c0_i32 = arith.constant 0 : i32
    %c0_i32_0 = arith.constant 0 : i32
    %c0_i32_1 = arith.constant 0 : i32
    return %c0_i32, %c0_i32_0 : i32, i32
  }
  func.func @transform_4(%arg0: i32) -> (i32, i32) {
    %c0_i32 = arith.constant 0 : i32
    %c0_i32_0 = arith.constant 0 : i32
    %c0_i32_1 = arith.constant 0 : i32
    return %c0_i32, %c0_i32_0 : i32, i32
  }
  func.func @transform_5(%arg0: i32) -> (i32, i32) {
    %c0_i32 = arith.constant 0 : i32
    %c0_i32_0 = arith.constant 0 : i32
    %c0_i32_1 = arith.constant 0 : i32
    return %c0_i32, %c0_i32_0 : i32, i32
  }
  func.func @transform_6(%arg0: i32) -> (i32, i32) {
    %c0_i32 = arith.constant 0 : i32
    %c0_i32_0 = arith.constant 0 : i32
    %c0_i32_1 = arith.constant 0 : i32
    return %c0_i32, %c0_i32_0 : i32, i32
  }
  func.func @transform_7(%arg0: i32) -> (i32, i32) {
    %c0_i32 = arith.constant 0 : i32
    %c0_i32_0 = arith.constant 0 : i32
    %c0_i32_1 = arith.constant 0 : i32
    return %c0_i32, %c0_i32_0 : i32, i32
  }
  func.func @transform_8(%arg0: i32) -> (i32, i32) {
    %c0_i32 = arith.constant 0 : i32
    %c0_i32_0 = arith.constant 0 : i32
    %c0_i32_1 = arith.constant 0 : i32
    return %c0_i32, %c0_i32_0 : i32, i32
  }
  func.func @transform_9(%arg0: i32) -> (i32, i32) {
    %c0_i32 = arith.constant 0 : i32
    %c0_i32_0 = arith.constant 0 : i32
    %c0_i32_1 = arith.constant 0 : i32
    return %c0_i32, %c0_i32_0 : i32, i32
  }
  func.func @transform_10(%arg0: i32) -> (i32, i32) {
    %c0_i32 = arith.constant 0 : i32
    %c0_i32_0 = arith.constant 0 : i32
    %c0_i32_1 = arith.constant 0 : i32
    return %c0_i32, %c0_i32_0 : i32, i32
  }
  func.func @transform_11(%arg0: i32) -> (i32, i32) {
    %c0_i32 = arith.constant 0 : i32
    %c0_i32_0 = arith.constant 0 : i32
    %c0_i32_1 = arith.constant 0 : i32
    return %c0_i32, %c0_i32_0 : i32, i32
  }
  func.func @transform_12(%arg0: i32) -> (i32, i32) {
    %c0_i32 = arith.constant 0 : i32
    %c0_i32_0 = arith.constant 0 : i32
    %c0_i32_1 = arith.constant 0 : i32
    return %c0_i32, %c0_i32_0 : i32, i32
  }
  func.func @transform_13(%arg0: i32) -> (i32, i32) {
    %c0_i32 = arith.constant 0 : i32
    %c0_i32_0 = arith.constant 0 : i32
    return %arg0, %c0_i32 : i32, i32
  }
}

</mosaic_0001>

<bundles_post_ra>
// kernel: tpu_custom_call.1
= control target key start
LH: loop header
LB: loop body
LE: loop exit
PB: predicated region body
PF: predicated region fallthrough
CT: control target
= control target key end

     0   :  { %18 = vsyncpa [#allocation3], 0  ;;  %s1516_s0 = inlined_call_operand.vmem [shape: bf16[8,784], index: 0, kind: input, shape index: {}]   ;;  %s1517_s1 = inlined_call_operand.hbm [shape: bf16[784,128], index: 1, kind: input, shape index: {}]   ;;  %s1518_s2 = inlined_call_operand.vmem [shape: f32[1,128], index: 2, kind: input, shape index: {}]   ;;  %s1519_s3 = inlined_call_operand.vmem [shape: bf16[128,64], index: 3, kind: input, shape index: {}]   ;;  %s1520_s4 = inlined_call_operand.vmem [shape: f32[1,64], index: 4, kind: input, shape index: {}]   ;;  %s1521_s5 = inlined_call_operand.vmem [shape: bf16[64,10], index: 5, kind: input, shape index: {}]   ;;  %s1522_s6 = inlined_call_operand.vmem [shape: f32[1,10], index: 6, kind: input, shape index: {}]   ;;  %s1523_s7 = inlined_call_operand.vmem [shape: bf16[10,10], index: 7, kind: input, shape index: {}]   ;;  %s1524_s8 = inlined_call_operand.vmem [shape: f32[1,10], index: 8, kind: input, shape index: {}]   ;;  %s1525_s9 = inlined_call_operand.vmem [shape: bf16[10,10], index: 9, kind: input, shape index: {}]   ;;  %s1526_s10 = inlined_call_operand.vmem [shape: f32[1,10], index: 10, kind: input, shape index: {}]   ;;  %s1527_s11 = inlined_call_operand.vmem [shape: bf16[10,128], index: 11, kind: input, shape index: {}]   ;;  %s1528_s12 = inlined_call_operand.vmem [shape: f32[1,128], index: 12, kind: input, shape index: {}]   ;;  %s1529_s13 = inlined_call_operand.hbm [shape: f32[8,128], index: 13, kind: output, shape index: {}]  }
   0x1   :  { %19 = vsyncpa [#allocation4], 0  ;;  %s26_s27 = sshll.u32 %s1517_s1, 4  ;;  %s1346_s28 = smov [#allocation2]   ;;  %s27_s27 = int_to_ptr.hbm [resolvable:$true] %s26_s27 }
   0x2   :  { %s28_s29 = sshll.u32 %s1346_s28, 4  ;;  %s1347_s30 = smov 64   ;;  %s29_s29 = int_to_ptr.vmem [resolvable:$true] %s28_s29 }
   0x3   :  { %s1348_s14 = smov 4  }
   0x4   :  { %34 = dma.hbm_to_vmem [thread:$0]  %s27_s27, 6272, %s29_s29, [#allocation3], %s1347_s30, %s1347_s30, %s1348_s14  }
   0x5   :  { %1342 = dma.done.wait [#allocation3], 6272  }
   0x6   :  { %1343 = vsyncadd [#allocation3], 4294961024  ;;  %v1203_v0 = vld [vmem:[#allocation2 + $0x38] sm:$0xff]  ;;  %v1202_v3 = vld [vmem:[#allocation2 + $0x30] sm:$0xff]  ;;  %vm486_vm0 = vcmask 130048   ;;  %vm738_vm9 = vcmask 523264  }
   0x7   :  { %v1211_v1 = vld [vmem:[#allocation2 + $0x78] sm:$0xff]  ;;  %490 = vmatpush.bf16.msra.mxu0 %v1203_v0  ;;  %v1210_v4 = vld [vmem:[#allocation2 + $0x70] sm:$0xff]  ;;  %v1201_v8 = vld [vmem:[#allocation2 + $0x28] sm:$0xff]  ;;  %vm790_vm10 = vcmask 1044480   ;;  %vm786_vm15 = vcmask 80896   ;;  %s1349_s20 = smov [#allocation5]  }
   0x8   :  { %v1219_v2 = vld [vmem:[#allocation2 + $0xb8] sm:$0xff]  ;;  %503 = vmatpush.bf16.msra.mxu1 %v1211_v1  ;;  %v1218_v5 = vld [vmem:[#allocation2 + $0xb0] sm:$0xff]  ;;  %v1209_v9 = vld [vmem:[#allocation2 + $0x68] sm:$0xff]  ;;  %s923_s21 = sshll.u32 %s1349_s20, 4  ;;  %s924_s21 = int_to_ptr.vmem [resolvable:$true] %s923_s21 }
   0x9   :  { %516 = vmatpush.bf16.msra.mxu2 %v1219_v2  ;;  %v1227_v6 = vld [vmem:[#allocation2 + $0xf8] sm:$0xff]  ;;  %v1226_v7 = vld [vmem:[#allocation2 + $0xf0] sm:$0xff]  ;;  %v1217_v10 = vld [vmem:[#allocation2 + $0xa8] sm:$0xff] }
   0xa   :  { %529 = vmatpush.bf16.msra.mxu3 %v1227_v6  ;;  %v1225_v11 = vld [vmem:[#allocation2 + $0xe8] sm:$0xff]  ;;  %v1200_v12 = vld [vmem:[#allocation2 + $0x20] sm:$0xff]  ;;  %v1199_v16 = vld [vmem:[#allocation2 + $0x18] sm:$0xff] }
   0xb   :  { %491 = vmatpush.bf16.msra.mxu0 %v1202_v3  ;;  %v1208_v13 = vld [vmem:[#allocation2 + $0x60] sm:$0xff]  ;;  %v1207_v17 = vld [vmem:[#allocation2 + $0x58] sm:$0xff]  ;;  %v1198_v20 = vld [vmem:[#allocation2 + $0x10] sm:$0xff] }
   0xc   :  { %504 = vmatpush.bf16.msra.mxu1 %v1210_v4  ;;  %v1216_v14 = vld [vmem:[#allocation2 + $0xa0] sm:$0xff]  ;;  %v1215_v18 = vld [vmem:[#allocation2 + $0x98] sm:$0xff]  ;;  %v1206_v21 = vld [vmem:[#allocation2 + $0x50] sm:$0xff] }
   0xd   :  { %517 = vmatpush.bf16.msra.mxu2 %v1218_v5  ;;  %v1224_v15 = vld [vmem:[#allocation2 + $0xe0] sm:$0xff]  ;;  %v1223_v19 = vld [vmem:[#allocation2 + $0xd8] sm:$0xff]  ;;  %v1214_v22 = vld [vmem:[#allocation2 + $0x90] sm:$0xff] }
   0xe   :  { %530 = vmatpush.bf16.msra.mxu3 %v1226_v7  ;;  %v1222_v23 = vld [vmem:[#allocation2 + $0xd0] sm:$0xff]  ;;  %v1197_v24 = vld [vmem:[#allocation2 + $0x8] sm:$0xff]  ;;  %v62_v26 = vld [vmem:[%s1516_s0] sm:$0xff] }
   0xf   :  { %492 = vmatpush.bf16.msra.mxu0 %v1201_v8  ;;  %v1205_v25 = vld [vmem:[#allocation2 + $0x48] sm:$0xff]  ;;  %v172_v29 = vunpack.c.l.b16 %v62_v26  ;;  %v173_v31 = vunpack.c.h.b16 %v62_v26  ;;  %v1196_v32 = vld [vmem:[#allocation2] sm:$0xff]  ;;  %v1235_v34 = vld [vmem:[#allocation2 + $0x138] sm:$0xff] }
  0x10   :  { %505 = vmatpush.bf16.msra.mxu1 %v1209_v9  ;;  %v1213_v27 = vld [vmem:[#allocation2 + $0x88] sm:$0xff]  ;;  %v1204_v33 = vld [vmem:[#allocation2 + $0x40] sm:$0xff]  ;;  %v1243_v35 = vld [vmem:[#allocation2 + $0x178] sm:$0xff] }
  0x11   :  { %518 = vmatpush.bf16.msra.mxu2 %v1217_v10  ;;  %v63_v28 = vld [vmem:[%s1516_s0 + $0x8] sm:$0xff]  ;;  %v1212_v36 = vld [vmem:[#allocation2 + $0x80] sm:$0xff]  ;;  %v179_v38 = vpack.c.b16 %v172_v29, %v172_v29  ;;  %v180_v39 = vpack.c.b16 %v173_v31, %v173_v31  ;;  %v1234_v43 = vld [vmem:[#allocation2 + $0x130] sm:$0xff] }
  0x12   :  { %531 = vmatpush.bf16.msra.mxu3 %v1225_v11  ;;  %v1221_v30 = vld [vmem:[#allocation2 + $0xc8] sm:$0xff]  ;;  %v174_v37 = vunpack.c.l.b16 %v63_v28  ;;  %v175_v40 = vunpack.c.h.b16 %v63_v28  ;;  %v1220_v41 = vld [vmem:[#allocation2 + $0xc0] sm:$0xff]  ;;  %v1242_v44 = vld [vmem:[#allocation2 + $0x170] sm:$0xff] }
  0x13   :  { %493 = vmatpush.bf16.msra.mxu0 %v1200_v12  ;;  %v1244_v42 = vld [vmem:[#allocation2 + $0x180] sm:$0xff]  ;;  %v1233_v47 = vld [vmem:[#allocation2 + $0x128] sm:$0xff]  ;;  %v65_v51 = vld [vmem:[%s1516_s0 + $0x18] sm:$0xf] }
  0x14   :  { %506 = vmatpush.bf16.msra.mxu1 %v1208_v13  ;;  %v181_v45 = vpack.c.b16 %v174_v37, %v174_v37  ;;  %v182_v46 = vpack.c.b16 %v175_v40, %v175_v40  ;;  %v1241_v48 = vld [vmem:[#allocation2 + $0x168] sm:$0xff]  ;;  %v1232_v49 = vld [vmem:[#allocation2 + $0x120] sm:$0xff]  ;;  %v1231_v52 = vld [vmem:[#allocation2 + $0x118] sm:$0xff]  ;;  %v178_v54 = vunpack.c.l.b16 %v65_v51 }
  0x15   :  { %519 = vmatpush.bf16.msra.mxu2 %v1216_v14  ;;  %v1240_v50 = vld [vmem:[#allocation2 + $0x160] sm:$0xff]  ;;  %v1239_v53 = vld [vmem:[#allocation2 + $0x158] sm:$0xff]  ;;  %v1230_v55 = vld [vmem:[#allocation2 + $0x110] sm:$0xff] }
  0x16   :  { %532 = vmatpush.bf16.msra.mxu3 %v1224_v15  ;;  %v1238_v56 = vld [vmem:[#allocation2 + $0x150] sm:$0xff]  ;;  %v185_v57 = vpack.c.b16 %v178_v54, %v178_v54  ;;  %v1229_v58 = vld [vmem:[#allocation2 + $0x108] sm:$0xff]  ;;  %v1228_v63 = vld [vmem:[#allocation2 + $0x100] sm:$0xff] }
  0x17   :  { %494 = vmatpush.bf16.msra.mxu0 %v1199_v16  ;;  %v1237_v59 = vld [vmem:[#allocation2 + $0x148] sm:$0xff]  ;;  %v64_v60 = vld [vmem:[%s1516_s0 + $0x10] sm:$0xff]  ;;  %v1236_v0 = vld [vmem:[#allocation2 + $0x140] sm:$0xff]  ;;  %s925_s0 = sshll.u32 %s1529_s13, 4  ;;  %s926_s0 = int_to_ptr.hbm [resolvable:$true] %s925_s0 }
  0x18   :  { %507 = vmatpush.bf16.msra.mxu1 %v1207_v17  ;;  %v176_v61 = vunpack.c.l.b16 %v64_v60  ;;  %v177_v62 = vunpack.c.h.b16 %v64_v60  ;;  %v1252_v5 = vld [vmem:[%s1519_s3 + $0x38] sm:$0xff]  ;;  %v1251_v6 = vld [vmem:[%s1519_s3 + $0x30] sm:$0xff]  ;;  %v1250_v11 = vld [vmem:[%s1519_s3 + $0x28] sm:$0xff] }
  0x19   :  { %520 = vmatpush.bf16.msra.mxu2 %v1215_v18  ;;  %v1264_v12 = vld [vmem:[%s1518_s2] ss:$0 sm:$0xff]  ;;  %v1248_v16 = vld [vmem:[%s1519_s3 + $0x18] sm:$0xff] }
  0x1a   :  { %533 = vmatpush.bf16.msra.mxu3 %v1223_v19  ;;  %v183_v1 = vpack.c.b16 %v176_v61, %v176_v61  ;;  %v184_v2 = vpack.c.b16 %v177_v62, %v177_v62  ;;  %v1249_v13 = vld [vmem:[%s1519_s3 + $0x20] sm:$0xff]  ;;  %v1247_v19 = vld [vmem:[%s1519_s3 + $0x10] sm:$0xff] }
  0x1b   :  { %495 = vmatpush.bf16.msra.mxu0 %v1198_v20  ;;  %v1245_v26 = vld [vmem:[%s1519_s3] sm:$0xff] }
  0x1c   :  { %508 = vmatpush.bf16.msra.mxu1 %v1206_v21  ;;  %v1253_v51 = vld [vmem:[%s1521_s5] sm:$0xff] }
  0x1d   :  { %521 = vmatpush.bf16.msra.mxu2 %v1214_v22  ;;  %v1246_v22 = vld [vmem:[%s1519_s3 + $0x8] sm:$0xff] }
  0x1e   :  { %534 = vmatpush.bf16.msra.mxu3 %v1222_v23 }
  0x1f   :  { %496 = vmatpush.bf16.msra.mxu0 %v1197_v24 }
  0x20   :  { %509 = vmatpush.bf16.msra.mxu1 %v1205_v25 }
  0x21   :  { %522 = vmatpush.bf16.msra.mxu2 %v1213_v27 }
  0x22   :  { %535 = vmatpush.bf16.msra.mxu3 %v1221_v30 }
  0x23   :  { %497 = vmatpush.bf16.msra.mxu0 %v1196_v32 }
  0x24   :  { %510 = vmatpush.bf16.msra.mxu1 %v1204_v33 }
  0x25   :  { %523 = vmatpush.bf16.msra.mxu2 %v1212_v36 }
  0x26   :  { %498 = vmatmul.bf16.vlgmr.msra.gmra.mxu0 %v179_v38  ;;  %536 = vmatpush.bf16.msra.mxu3 %v1220_v41 }
  0x27   :  { %542 = vmatpush.bf16.msrb.mxu0 %v1235_v34  ;;  %511 = vmatmul.bf16.vlgmr.msra.gmra.mxu1 %v180_v39 }
  0x28   :  { %555 = vmatpush.bf16.msrb.mxu1 %v1243_v35  ;;  %524 = vmatmul.bf16.vlgmr.msra.gmra.mxu2 %v181_v45 }
  0x29   :  { %575 = vmatpush.bf16.msrb.mxu2 %v1244_v42  ;;  %537 = vmatmul.bf16.vlgmr.msra.gmra.mxu3 %v182_v46 }
  0x2a   :  { %669 = vmatpush.bf16.msrb.mxu3 %v1252_v5 }
  0x2b   :  { %543 = vmatpush.bf16.msrb.mxu0 %v1234_v43 }
  0x2c   :  { %556 = vmatpush.bf16.msrb.mxu1 %v1242_v44 }
  0x2e   :  { %670 = vmatpush.bf16.msrb.mxu3 %v1251_v6 }
  0x2f   :  { %544 = vmatpush.bf16.msrb.mxu0 %v1233_v47 }
  0x30   :  { %557 = vmatpush.bf16.msrb.mxu1 %v1241_v48  ;;  %v1256_v48 = vld [vmem:[%s1521_s5 + $0x18] sm:$0xff] }
  0x31   :  { %746 = vmatpush.bf16.msra.mxu2 %v1256_v48 }
  0x32   :  { %671 = vmatpush.bf16.msrb.mxu3 %v1250_v11 }
  0x33   :  { %545 = vmatpush.bf16.msrb.mxu0 %v1232_v49  ;;  %v1255_v49 = vld [vmem:[%s1521_s5 + $0x10] sm:$0xff] }
  0x34   :  { %558 = vmatpush.bf16.msrb.mxu1 %v1240_v50  ;;  %v1254_v50 = vld [vmem:[%s1521_s5 + $0x8] sm:$0xff] }
  0x35   :  { %747 = vmatpush.bf16.msra.mxu2 %v1255_v49 }
  0x36   :  { %672 = vmatpush.bf16.msrb.mxu3 %v1249_v13 }
  0x37   :  { %546 = vmatpush.bf16.msrb.mxu0 %v1231_v52  ;;  %v1265_v52 = vld [vmem:[%s1520_s4] ss:$0 sm:$0xff] }
  0x38   :  { %559 = vmatpush.bf16.msrb.mxu1 %v1239_v53  ;;  %1131 = vmatmul.msk.bf16.vlgmr.msrb.gmra.mxu2 %vm486_vm0, %v185_v57 }
  0x39   :  { %748 = vmatpush.bf16.msra.mxu2 %v1254_v50 }
  0x3a   :  { %673 = vmatpush.bf16.msrb.mxu3 %v1248_v16 }
  0x3b   :  { %547 = vmatpush.bf16.msrb.mxu0 %v1230_v55 }
  0x3c   :  { %560 = vmatpush.bf16.msrb.mxu1 %v1238_v56 }
  0x3d   :  { %749 = vmatpush.bf16.msra.mxu2 %v1253_v51 }
  0x3e   :  { %674 = vmatpush.bf16.msrb.mxu3 %v1247_v19 }
  0x3f   :  { %548 = vmatpush.bf16.msrb.mxu0 %v1229_v58 }
  0x40   :  { %561 = vmatpush.bf16.msrb.mxu1 %v1237_v59 }
  0x42   :  { %675 = vmatpush.bf16.msrb.mxu3 %v1246_v22 }
  0x43   :  { %549 = vmatpush.bf16.msrb.mxu0 %v1228_v63 }
  0x44   :  { %562 = vmatpush.bf16.msrb.mxu1 %v1236_v0 }
  0x46   :  { %550 = vmatmul.bf16.vlgmr.msrb.gmra.mxu0 %v183_v1  ;;  %676 = vmatpush.bf16.msrb.mxu3 %v1245_v26 }
  0x47   :  { %563 = vmatmul.bf16.vlgmr.msrb.gmra.mxu1 %v184_v2 }
  0xa3   :  { %v499_v3 = vpop.f32.mrf.mxu0 }
  0xa4   :  { %v512_v4 = vpop.f32.mrf.mxu1  ;;  %v500_v14 = vadd.f32 %v1264_v12, %v499_v3 }
  0xa6   :  { %v513_v18 = vadd.f32 %v512_v4, %v500_v14 }
  0xab   :  { %v501_v7 = vpop.f32.mrf.mxu0  ;;  %v525_v9 = vpop.f32.mrf.mxu2 }
  0xac   :  { %v514_v8 = vpop.f32.mrf.mxu1  ;;  %v538_v10 = vpop.f32.mrf.mxu3  ;;  %v526_v20 = vadd.f32 %v525_v9, %v513_v18  ;;  %v1183_v7 = vld [vmem:[%s1523_s7] sm:$0xf] }
  0xad   :  { %v1257_v8 = vld [vmem:[%s1523_s7] sm:$0x10] }
  0xae   :  { %v539_v23 = vadd.f32 %v538_v10, %v526_v20  ;;  %v1184_v9 = vor.u32 %v1257_v8, %v1183_v7  ;;  %v1266_v10 = vld [vmem:[%s1522_s6] ss:$0 sm:$0xff] }
  0xb0   :  { %v792_v11 = vsel %vm790_vm10, %v1184_v9, 0 }
  0xb1   :  { %801 = vmatpush.bf16.msra.mxu0 %v792_v11 }
  0xb3   :  { %v527_v15 = vpop.f32.mrf.mxu2 }
  0xb4   :  { %v540_v17 = vpop.f32.mrf.mxu3 }
  0xbb   :  { %v577_v21 = vpop.f32.mrf.mxu2 }
  0xc3   :  { %v551_v24 = vpop.f32.mrf.mxu0  ;;  %v579_v29 = vpop.f32.mrf.mxu2 }
  0xc4   :  { %v564_v25 = vpop.f32.mrf.mxu1  ;;  %v552_v27 = vadd.f32 %v551_v24, %v539_v23 }
  0xc6   :  { %v565_v28 = vadd.f32 %v564_v25, %v552_v27 }
  0xc8   :  { %v578_v30 = vadd.f32 %v577_v21, %v565_v28 }
  0xca   :  { %v581_v31 = vsub.f32 0.0, %v578_v30  ;;  %v1188_v30 = vld [vmem:[%s1525_s9] sm:$0xf] }
  0xcb   :  { %v553_v32 = vpop.f32.mrf.mxu0 }
  0xcc   :  { %v566_v33 = vpop.f32.mrf.mxu1  ;;  %v582_v34 = vmul.f32 1.442695, %v581_v31  ;;  %v1258_v31 = vld [vmem:[%s1525_s9] sm:$0x10] }
  0xcd   :  { %v1189_v32 = vor.u32 %v1258_v31, %v1188_v30  ;;  %v1267_v33 = vld [vmem:[%s1524_s8] ss:$0 sm:$0xff] }
  0xce   :  { %1270 = vpow2.f32 %v582_v34 }
  0xcf   :  { %v842_v34 = vsel %vm790_vm10, %v1189_v32, 0 }
  0xd0   :  { %851 = vmatpush.bf16.msra.mxu1 %v842_v34 }
  0xd4   :  { %v1271_v35 = vpop.eup %1270 }
  0xd5   :  { %v584_v36 = vadd.f32 1.0, %v1271_v35 }
  0xd7   :  { %1272 = vrcp.f32 %v584_v36  ;;  %v596_v40 = vand.u32 2147483648, %v584_v36  ;;  %v594_v42 = vand.u32 2147483647, %v584_v36  ;;  %vm590_vm2 = vweird.f32 %v584_v36 }
  0xd9   :  { %v597_v44 = vor.u32 1.1754944e-38, %v596_v40  ;;  %vm595_vm4 = vcmp.eq.f32.partialorder %v594_v42, 8.507059e+37 }
  0xdd   :  { %v1273_v37 = vpop.eup %1272 }
  0xde   :  { %v586_v38 = vmul.f32 %v1273_v37, %v584_v36  ;;  %vm591_vm1 = vweird.f32 %v1273_v37 }
  0xdf   :  { %vm592_vm3 = vmor %vm590_vm2, %vm591_vm1 }
  0xe0   :  { %v587_v39 = vsub.f32 1.0, %v586_v38 }
  0xe2   :  { %v588_v41 = vmul.f32 %v1273_v37, %v587_v39 }
  0xe4   :  { %v589_v43 = vadd.f32 %v1273_v37, %v588_v41 }
  0xe6   :  { %v593_v45 = vsel %vm592_vm3, %v1273_v37, %v589_v43 }
  0xe7   :  { %v598_v46 = vsel %vm595_vm4, %v597_v44, %v593_v45 }
  0xe8   :  { %v600_v47 = vpack.c.bf16 %v598_v46, %v598_v46 }
  0xea   :  { %677 = vmatmul.bf16.vlgmr.msrb.gmra.mxu3 %v600_v47 }
 0x16d   :  { %v678_v53 = vpop.f32.mrf.mxu3 }
 0x16e   :  { %v679_v54 = vadd.f32 %v1265_v52, %v678_v53  ;;  %v1193_v53 = vld [vmem:[%s1527_s11] sm:$0xf] }
 0x170   :  { %v682_v55 = vsub.f32 0.0, %v679_v54  ;;  %v1259_v54 = vld [vmem:[%s1527_s11] sm:$0x10] }
 0x172   :  { %v683_v56 = vmul.f32 1.442695, %v682_v55  ;;  %v1194_v55 = vor.u32 %v1259_v54, %v1193_v53 }
 0x174   :  { %1274 = vpow2.f32 %v683_v56  ;;  %v1268_v56 = vld [vmem:[%s1526_s10] ss:$0 sm:$0xff] }
 0x175   :  { %v680_v57 = vpop.f32.mrf.mxu3 }
 0x176   :  { %v892_v57 = vsel %vm790_vm10, %v1194_v55, 0 }
 0x177   :  { %901 = vmatpush.bf16.msrb.mxu2 %v892_v57 }
 0x17a   :  { %v1275_v58 = vpop.eup %1274 }
 0x17b   :  { %v685_v59 = vadd.f32 1.0, %v1275_v58 }
 0x17d   :  { %1276 = vrcp.f32 %v685_v59  ;;  %v697_v63 = vand.u32 2147483648, %v685_v59  ;;  %v695_v1 = vand.u32 2147483647, %v685_v59  ;;  %vm691_vm6 = vweird.f32 %v685_v59 }
 0x17f   :  { %v698_v3 = vor.u32 1.1754944e-38, %v697_v63  ;;  %vm696_vm8 = vcmp.eq.f32.partialorder %v695_v1, 8.507059e+37 }
 0x183   :  { %v1277_v60 = vpop.eup %1276 }
 0x184   :  { %v687_v61 = vmul.f32 %v1277_v60, %v685_v59  ;;  %vm692_vm5 = vweird.f32 %v1277_v60 }
 0x185   :  { %vm693_vm7 = vmor %vm691_vm6, %vm692_vm5 }
 0x186   :  { %v688_v62 = vsub.f32 1.0, %v687_v61 }
 0x188   :  { %v689_v0 = vmul.f32 %v1277_v60, %v688_v62 }
 0x18a   :  { %v690_v2 = vadd.f32 %v1277_v60, %v689_v0 }
 0x18c   :  { %v694_v4 = vsel %vm693_vm7, %v1277_v60, %v690_v2 }
 0x18d   :  { %v699_v5 = vsel %vm696_vm8, %v698_v3, %v694_v4 }
 0x18e   :  { %v701_v6 = vpack.c.bf16 %v699_v5, %v699_v5 }
 0x190   :  { %1180 = vmatmul.msk.bf16.vlgmr.msra.gmra.mxu2 %vm738_vm9, %v701_v6 }
 0x213   :  { %v751_v12 = vpop.f32.mrf.mxu2 }
 0x214   :  { %v752_v13 = vadd.f32 %v1266_v10, %v751_v12  ;;  %v1269_v12 = vld [vmem:[%s1528_s12] ss:$0 sm:$0xff] }
 0x216   :  { %v755_v14 = vsub.f32 0.0, %v752_v13 }
 0x218   :  { %v756_v15 = vmul.f32 1.442695, %v755_v14 }
 0x21a   :  { %1278 = vpow2.f32 %v756_v15 }
 0x21b   :  { %v753_v16 = vpop.f32.mrf.mxu2 }
 0x220   :  { %v1279_v17 = vpop.eup %1278 }
 0x221   :  { %v758_v18 = vadd.f32 1.0, %v1279_v17 }
 0x223   :  { %1280 = vrcp.f32 %v758_v18  ;;  %v770_v22 = vand.u32 2147483648, %v758_v18  ;;  %v768_v24 = vand.u32 2147483647, %v758_v18  ;;  %vm764_vm12 = vweird.f32 %v758_v18 }
 0x225   :  { %v771_v26 = vor.u32 1.1754944e-38, %v770_v22  ;;  %vm769_vm14 = vcmp.eq.f32.partialorder %v768_v24, 8.507059e+37 }
 0x229   :  { %v1281_v19 = vpop.eup %1280 }
 0x22a   :  { %v760_v20 = vmul.f32 %v1281_v19, %v758_v18  ;;  %vm765_vm11 = vweird.f32 %v1281_v19 }
 0x22b   :  { %vm766_vm13 = vmor %vm764_vm12, %vm765_vm11 }
 0x22c   :  { %v761_v21 = vsub.f32 1.0, %v760_v20 }
 0x22e   :  { %v762_v23 = vmul.f32 %v1281_v19, %v761_v21 }
 0x230   :  { %v763_v25 = vadd.f32 %v1281_v19, %v762_v23 }
 0x232   :  { %v767_v27 = vsel %vm766_vm13, %v1281_v19, %v763_v25 }
 0x233   :  { %v772_v28 = vsel %vm769_vm14, %v771_v26, %v767_v27 }
 0x234   :  { %v774_v29 = vpack.c.bf16 %v772_v28, %v772_v28 }
 0x236   :  { %1185 = vmatmul.msk.bf16.vlgmr.msra.gmra.mxu0 %vm786_vm15, %v774_v29 }
 0x2b3   :  { %v803_v35 = vpop.f32.mrf.mxu0 }
 0x2b4   :  { %v804_v36 = vadd.f32 %v1267_v33, %v803_v35 }
 0x2b6   :  { %v807_v37 = vsub.f32 0.0, %v804_v36 }
 0x2b8   :  { %v808_v38 = vmul.f32 1.442695, %v807_v37 }
 0x2ba   :  { %1282 = vpow2.f32 %v808_v38 }
 0x2bb   :  { %v805_v39 = vpop.f32.mrf.mxu0 }
 0x2c0   :  { %v1283_v40 = vpop.eup %1282 }
 0x2c1   :  { %v810_v41 = vadd.f32 1.0, %v1283_v40 }
 0x2c3   :  { %1284 = vrcp.f32 %v810_v41  ;;  %v822_v45 = vand.u32 2147483648, %v810_v41  ;;  %v820_v47 = vand.u32 2147483647, %v810_v41  ;;  %vm816_vm1 = vweird.f32 %v810_v41 }
 0x2c5   :  { %v823_v49 = vor.u32 1.1754944e-38, %v822_v45  ;;  %vm821_vm3 = vcmp.eq.f32.partialorder %v820_v47, 8.507059e+37 }
 0x2c9   :  { %v1285_v42 = vpop.eup %1284 }
 0x2ca   :  { %v812_v43 = vmul.f32 %v1285_v42, %v810_v41  ;;  %vm817_vm0 = vweird.f32 %v1285_v42 }
 0x2cb   :  { %vm818_vm2 = vmor %vm816_vm1, %vm817_vm0 }
 0x2cc   :  { %v813_v44 = vsub.f32 1.0, %v812_v43 }
 0x2ce   :  { %v814_v46 = vmul.f32 %v1285_v42, %v813_v44 }
 0x2d0   :  { %v815_v48 = vadd.f32 %v1285_v42, %v814_v46 }
 0x2d2   :  { %v819_v50 = vsel %vm818_vm2, %v1285_v42, %v815_v48 }
 0x2d3   :  { %v824_v51 = vsel %vm821_vm3, %v823_v49, %v819_v50 }
 0x2d4   :  { %v826_v52 = vpack.c.bf16 %v824_v51, %v824_v51 }
 0x2d6   :  { %1190 = vmatmul.msk.bf16.vlgmr.msra.gmra.mxu1 %vm786_vm15, %v826_v52 }
 0x353   :  { %v853_v58 = vpop.f32.mrf.mxu1 }
 0x354   :  { %v854_v59 = vadd.f32 %v1268_v56, %v853_v58 }
 0x356   :  { %v857_v60 = vsub.f32 0.0, %v854_v59 }
 0x358   :  { %v858_v61 = vmul.f32 1.442695, %v857_v60 }
 0x35a   :  { %1286 = vpow2.f32 %v858_v61 }
 0x35b   :  { %v855_v62 = vpop.f32.mrf.mxu1 }
 0x360   :  { %v1287_v63 = vpop.eup %1286 }
 0x361   :  { %v860_v0 = vadd.f32 1.0, %v1287_v63 }
 0x363   :  { %1288 = vrcp.f32 %v860_v0  ;;  %v872_v4 = vand.u32 2147483648, %v860_v0  ;;  %v870_v6 = vand.u32 2147483647, %v860_v0  ;;  %vm866_vm5 = vweird.f32 %v860_v0 }
 0x365   :  { %v873_v8 = vor.u32 1.1754944e-38, %v872_v4  ;;  %vm871_vm7 = vcmp.eq.f32.partialorder %v870_v6, 8.507059e+37 }
 0x369   :  { %v1289_v1 = vpop.eup %1288 }
 0x36a   :  { %v862_v2 = vmul.f32 %v1289_v1, %v860_v0  ;;  %vm867_vm4 = vweird.f32 %v1289_v1 }
 0x36b   :  { %vm868_vm6 = vmor %vm866_vm5, %vm867_vm4 }
 0x36c   :  { %v863_v3 = vsub.f32 1.0, %v862_v2 }
 0x36e   :  { %v864_v5 = vmul.f32 %v1289_v1, %v863_v3 }
 0x370   :  { %v865_v7 = vadd.f32 %v1289_v1, %v864_v5 }
 0x372   :  { %v869_v9 = vsel %vm868_vm6, %v1289_v1, %v865_v7 }
 0x373   :  { %v874_v10 = vsel %vm871_vm7, %v873_v8, %v869_v9 }
 0x374   :  { %v876_v11 = vpack.c.bf16 %v874_v10, %v874_v10 }
 0x376   :  { %1195 = vmatmul.msk.bf16.vlgmr.msrb.gmra.mxu2 %vm786_vm15, %v876_v11 }
 0x3f9   :  { %v903_v13 = vpop.f32.mrf.mxu2 }
 0x3fa   :  { %v904_v14 = vadd.f32 %v1269_v12, %v903_v13 }
 0x3fc   :  { %907 = vmax.xlane.f32.xlu0 %v904_v14 }
 0x401   :  { %v905_v15 = vpop.f32.mrf.mxu2 }
 0x46f   :  { %v908_v16 = vpop.xlane.xlu0 %907 }
 0x470   :  { %v909_v17 = vsub.f32 %v904_v14, %v908_v16 }
 0x472   :  { %v910_v18 = vmul.f32 1.442695, %v909_v17 }
 0x474   :  { %1290 = vpow2.f32 %v910_v18 }
 0x47a   :  { %v1291_v19 = vpop.eup %1290 }
 0x47b   :  { %912 = vadd.xlane.f32.xlu0 %v1291_v19 }
 0x4ee   :  { %v913_v20 = vpop.xlane.xlu0 %912 }
 0x4ef   :  { %1292 = vlog2.f32 %v913_v20 }
 0x4f5   :  { %v1293_v21 = vpop.eup %1292 }
 0x4f6   :  { %v915_v22 = vmul.f32 0.6931472, %v1293_v21 }
 0x4f8   :  { %v916_v23 = vsub.f32 %v909_v17, %v915_v22 }
 0x4fa   :  { %917 = vst [vmem:[#allocation5] sm:$0xff] %v916_v23 }
 0x4fb   :  { %928 = dma.vmem_to_hbm [thread:$0]  %s924_s21, 128, %s926_s0, [#allocation4]  }
 0x4fc   :  { %1344 = dma.done.wait [#allocation4], 128  }
 0x4fd   :  { %1345 = vsyncadd [#allocation4], 4294967168 }
 0x4fe   :  { %933 = vsyncpa [#allocation3], 1 }
 0x4ff   :  { %934 = vsyncpa [#allocation4], 1 }

</bundles_post_ra>
